<compile_context>
chip_gen: v5e
topology: v5e:2x2
jax: 0.10.0
libtpu: 0.0.40
codegen_flags: <defaults>
</compile_context>

<pallas_src>
import functools
import math

import jax
import jax.numpy as jnp
from jax import lax
from jax.experimental import pallas as pl
from jax.experimental.pallas import tpu as pltpu

_LANE = 128


def _round_up(n, m):
    return ((n + m - 1) // m) * m


def _mhsa_kernel(x_ref, w_ref, o_ref, *, n_heads, d_k, dk_pad, dv_pad):
    """All heads in ONE step, everything VMEM-resident.

    x_ref : [S, D_in]
    w_ref : [D_in, n_heads * (2*dk_pad + dv_pad)]   lane-aligned q|k|v segments
    o_ref : [S, n_heads * dv_pad]                    lane-dense output
    """
    seg = 2 * dk_pad + dv_pad
    scale = 1.0 / math.sqrt(d_k)        # one tiny VPU mul on q, in-kernel

    x = x_ref[...]                      # native dtype straight to the MXU
    w = w_ref[...]

    # Single fused projection for ALL heads, f32 accumulate on the MXU.
    qkv = jnp.dot(x, w, preferred_element_type=jnp.float32)   # [S, H*seg]

    # H is tiny -> static unroll; every slice offset/width is a static
    # multiple of 128 lanes (vreg-aligned, no masked selects).
    for h in range(n_heads):
        base = h * seg
        q = qkv[:, base:base + dk_pad] * scale             # padded cols are 0
        k = qkv[:, base + dk_pad:base + 2 * dk_pad]
        v = qkv[:, base + 2 * dk_pad:base + seg]

        # scores = q @ k^T: contract the last (padded feature) axes; zero
        # padding contributes nothing to the contraction.
        scores = lax.dot_general(q, k, (((1,), (1,)), ((), ())),
                                 preferred_element_type=jnp.float32)  # [S, S]

        # Numerically-stable softmax over dim=1 (last axis of 2-D scores).
        m = jnp.max(scores, axis=-1, keepdims=True)
        e = jnp.exp(scores - m)
        attn = e / jnp.sum(e, axis=-1, keepdims=True)

        out_h = jnp.dot(attn, v, preferred_element_type=jnp.float32)  # [S, dv_pad]
        # Lane-aligned, unmasked store into the lane-dense output slab.
        o_ref[:, h * dv_pad:(h + 1) * dv_pad] = out_h.astype(o_ref.dtype)


def pack_qkv_weights(wq, wk, wv):
    """Setup-time weight packing (NOT in the per-forward hot path).

    wq, wk : [H, D_in, d_k]   wv : [H, D_in, d_v]
    (weights stored [D_in, d_out], i.e. transpose of nn.Linear's [d_out, d_in])
    Returns W_all : [D_in, H * (2*dk_pad + dv_pad)] with every per-head q|k|v
    segment zero-padded to a 128-lane boundary.
    """
    H, D_in, _ = wq.shape
    d_k = wq.shape[-1]
    d_v = wv.shape[-1]
    dk_pad = _round_up(d_k, _LANE)
    dv_pad = _round_up(d_v, _LANE)

    def pad_last(w, width):
        return jnp.pad(w, ((0, 0), (0, 0), (0, width - w.shape[-1])))

    w = jnp.concatenate([pad_last(wq, dk_pad),
                         pad_last(wk, dk_pad),
                         pad_last(wv, dv_pad)], axis=-1)          # [H, D_in, seg]
    return jnp.transpose(w, (1, 0, 2)).reshape(D_in, H * (2 * dk_pad + dv_pad))


def multi_head_self_attention(x, w_all, *, n_heads, d_k, d_v):
    """Hot-path forward: x [S, D_in], pre-packed w_all -> [H, S, d_v]."""
    S, D_in = x.shape
    dk_pad = _round_up(d_k, _LANE)
    dv_pad = _round_up(d_v, _LANE)
    seg = 2 * dk_pad + dv_pad
    assert w_all.shape == (D_in, n_heads * seg)

    kernel = functools.partial(_mhsa_kernel, n_heads=n_heads, d_k=d_k,
                               dk_pad=dk_pad, dv_pad=dv_pad)
    out = pl.pallas_call(
        kernel,
        out_shape=jax.ShapeDtypeStruct((S, n_heads * dv_pad), x.dtype),
        grid=(1,),                       # one step: no per-head grid overhead
        in_specs=[
            pl.BlockSpec((S, D_in), lambda i: (0, 0)),
            pl.BlockSpec((D_in, n_heads * seg), lambda i: (0, 0)),
        ],
        out_specs=pl.BlockSpec((S, n_heads * dv_pad), lambda i: (0, 0)),
        compiler_params=pltpu.CompilerParams(
            dimension_semantics=("arbitrary",)),  # single step: no megacore split
    )(x, w_all)

    # Layout plumbing only: lane-dense [S, H*dv_pad] -> [H, S, d_v].
    return out.reshape(S, n_heads, dv_pad).transpose(1, 0, 2)[:, :, :d_v]


def self_attention_head(x, wq, wk, wv, d_k):
    """Exact equivalent of the PyTorch module's forward (single head).

    Convenience path: packs per call.  For repeated calls, pack once with
    pack_qkv_weights and call multi_head_self_attention directly.
    """
    d_v = wv.shape[-1]
    w_all = pack_qkv_weights(wq[None], wk[None], wv[None])
    return multi_head_self_attention(x, w_all, n_heads=1, d_k=d_k, d_v=d_v)[0]


def self_attention_head_ref(x, wq, wk, wv, d_k):
    q = x @ wq
    k = x @ wk
    v = x @ wv
    scores = (q @ k.T) / math.sqrt(d_k)
    attn = jax.nn.softmax(scores, axis=1)
    return attn @ v


if __name__ == "__main__":
    # Small shapes consistent with the module's 2-D forward.
    seq, input_size, d_k, d_v, H = 8, 32, 16, 16, 4

    key = jax.random.PRNGKey(0)
    kx, kq, kk, kv = jax.random.split(key, 4)

    x = jax.random.normal(kx, (seq, input_size), dtype=jnp.float32)

    # nn.Linear default init U(-1/sqrt(in), 1/sqrt(in)); weights stored [D_in, d_out].
    bound = 1.0 / math.sqrt(input_size)
    wq = jax.random.uniform(kq, (H, input_size, d_k), jnp.float32, -bound, bound)
    wk = jax.random.uniform(kk, (H, input_size, d_k), jnp.float32, -bound, bound)
    wv = jax.random.uniform(kv, (H, input_size, d_v), jnp.float32, -bound, bound)

    # Pack once at setup time (hoisted out of the per-forward hot path).
    w_all = jax.block_until_ready(pack_qkv_weights(wq, wk, wv))

    # --- all heads in one kernel step ---
    out_h = multi_head_self_attention(x, w_all, n_heads=H, d_k=d_k, d_v=d_v)
    out_h = jax.block_until_ready(out_h)
    ref_h = jnp.stack([self_attention_head_ref(x, wq[h], wk[h], wv[h], d_k)
                       for h in range(H)])
    assert out_h.shape == (H, seq, d_v)
    assert jnp.allclose(out_h, ref_h, atol=1e-3, rtol=1e-3), "multi-head mismatch"

    # --- the module's forward (single head) ---
    out1 = self_attention_head(x, wq[0], wk[0], wv[0], d_k)
    out1 = jax.block_until_ready(out1)
    assert out1.shape == (seq, d_v)
    assert jnp.allclose(out1, ref_h[0], atol=1e-3, rtol=1e-3), "single-head mismatch"

    print("KERNEL_OK")
</pallas_src>

<mosaic_0001>
module attributes {stable_mosaic.version = 11 : i64} {
  func.func @_mhsa_kernel(%arg0: i32, %arg1: memref<8x32xf32, #tpu.memory_space<vmem>>, %arg2: memref<32x1536xf32, #tpu.memory_space<vmem>>, %arg3: memref<8x512xf32, #tpu.memory_space<vmem>>) attributes {dimension_semantics = [#tpu.dimension_semantics<arbitrary>], iteration_bounds = array<i64: 1>, scalar_prefetch = 0 : i64, scratch_operands = 0 : i64, tpu.core_type = #tpu.core_type<tc>, window_params = [{pipeline_mode = #tpu.pipeline_mode<synchronous>, transform_indices = @transform_0, window_bounds = array<i64: 8, 32>}, {pipeline_mode = #tpu.pipeline_mode<synchronous>, transform_indices = @transform_1, window_bounds = array<i64: 32, 1536>}, {pipeline_mode = #tpu.pipeline_mode<synchronous>, transform_indices = @transform_2, window_bounds = array<i64: 8, 512>}]} {
    %c0 = arith.constant 0 : index
    %c0_0 = arith.constant 0 : index
    %0 = vector.load %arg1[%c0, %c0_0] : memref<8x32xf32, #tpu.memory_space<vmem>>, vector<8x32xf32>
    %c0_1 = arith.constant 0 : index
    %c0_2 = arith.constant 0 : index
    %1 = vector.load %arg2[%c0_1, %c0_2] : memref<32x1536xf32, #tpu.memory_space<vmem>>, vector<32x1536xf32>
    %cst = arith.constant dense<0.000000e+00> : vector<8x1536xf32>
    %2 = tpu.matmul %0, %1, %cst {dimension_numbers = #tpu.dot_dimension_numbers<[1], [0], [0], [1], [0, 0, 1, 1], [], []>} : vector<8x32xf32>, vector<32x1536xf32>, vector<8x1536xf32> -> vector<8x1536xf32>
    %3 = vector.extract_strided_slice %2 {offsets = [0, 0], sizes = [8, 128], strides = [1, 1]} : vector<8x1536xf32> to vector<8x128xf32>
    %cst_3 = arith.constant 2.500000e-01 : f32
    %4 = vector.broadcast %cst_3 : f32 to vector<8x128xf32>
    %5 = arith.mulf %3, %4 : vector<8x128xf32>
    %6 = vector.extract_strided_slice %2 {offsets = [0, 128], sizes = [8, 128], strides = [1, 1]} : vector<8x1536xf32> to vector<8x128xf32>
    %7 = vector.extract_strided_slice %2 {offsets = [0, 256], sizes = [8, 128], strides = [1, 1]} : vector<8x1536xf32> to vector<8x128xf32>
    %cst_4 = arith.constant dense<0.000000e+00> : vector<8x8xf32>
    %8 = tpu.matmul %5, %6, %cst_4 {dimension_numbers = #tpu.dot_dimension_numbers<[1], [1], [0], [0], [0, 0, 1, 0], [], []>} : vector<8x128xf32>, vector<8x128xf32>, vector<8x8xf32> -> vector<8x8xf32>
    %cst_5 = arith.constant dense<0xFF800000> : vector<8xf32>
    %9 = vector.multi_reduction <maximumf>, %8, %cst_5 [1] : vector<8x8xf32> to vector<8xf32>
    %10 = vector.shape_cast %9 : vector<8xf32> to vector<8x1xf32>
    %11 = vector.broadcast %10 : vector<8x1xf32> to vector<8x8xf32>
    %12 = arith.subf %8, %11 : vector<8x8xf32>
    %13 = math.exp %12 : vector<8x8xf32>
    %cst_6 = arith.constant dense<0.000000e+00> : vector<8xf32>
    %14 = vector.multi_reduction <add>, %13, %cst_6 [1] : vector<8x8xf32> to vector<8xf32>
    %15 = vector.shape_cast %14 : vector<8xf32> to vector<8x1xf32>
    %16 = vector.broadcast %15 : vector<8x1xf32> to vector<8x8xf32>
    %17 = arith.divf %13, %16 : vector<8x8xf32>
    %cst_7 = arith.constant dense<0.000000e+00> : vector<8x128xf32>
    %18 = tpu.matmul %17, %7, %cst_7 {dimension_numbers = #tpu.dot_dimension_numbers<[1], [0], [0], [1], [0, 0, 1, 1], [], []>} : vector<8x8xf32>, vector<8x128xf32>, vector<8x128xf32> -> vector<8x128xf32>
    %c0_8 = arith.constant 0 : index
    %c0_9 = arith.constant 0 : index
    %19 = vector.load %arg3[%c0_8, %c0_9] : memref<8x512xf32, #tpu.memory_space<vmem>>, vector<8x128xf32>
    tpu.vector_store %arg3[%c0_8, %c0_9], %18 {strides = array<i32>} : memref<8x512xf32, #tpu.memory_space<vmem>>, vector<8x128xf32>,
    %20 = vector.extract_strided_slice %2 {offsets = [0, 384], sizes = [8, 128], strides = [1, 1]} : vector<8x1536xf32> to vector<8x128xf32>
    %cst_10 = arith.constant 2.500000e-01 : f32
    %21 = vector.broadcast %cst_10 : f32 to vector<8x128xf32>
    %22 = arith.mulf %20, %21 : vector<8x128xf32>
    %23 = vector.extract_strided_slice %2 {offsets = [0, 512], sizes = [8, 128], strides = [1, 1]} : vector<8x1536xf32> to vector<8x128xf32>
    %24 = vector.extract_strided_slice %2 {offsets = [0, 640], sizes = [8, 128], strides = [1, 1]} : vector<8x1536xf32> to vector<8x128xf32>
    %cst_11 = arith.constant dense<0.000000e+00> : vector<8x8xf32>
    %25 = tpu.matmul %22, %23, %cst_11 {dimension_numbers = #tpu.dot_dimension_numbers<[1], [1], [0], [0], [0, 0, 1, 0], [], []>} : vector<8x128xf32>, vector<8x128xf32>, vector<8x8xf32> -> vector<8x8xf32>
    %cst_12 = arith.constant dense<0xFF800000> : vector<8xf32>
    %26 = vector.multi_reduction <maximumf>, %25, %cst_12 [1] : vector<8x8xf32> to vector<8xf32>
    %27 = vector.shape_cast %26 : vector<8xf32> to vector<8x1xf32>
    %28 = vector.broadcast %27 : vector<8x1xf32> to vector<8x8xf32>
    %29 = arith.subf %25, %28 : vector<8x8xf32>
    %30 = math.exp %29 : vector<8x8xf32>
    %cst_13 = arith.constant dense<0.000000e+00> : vector<8xf32>
    %31 = vector.multi_reduction <add>, %30, %cst_13 [1] : vector<8x8xf32> to vector<8xf32>
    %32 = vector.shape_cast %31 : vector<8xf32> to vector<8x1xf32>
    %33 = vector.broadcast %32 : vector<8x1xf32> to vector<8x8xf32>
    %34 = arith.divf %30, %33 : vector<8x8xf32>
    %cst_14 = arith.constant dense<0.000000e+00> : vector<8x128xf32>
    %35 = tpu.matmul %34, %24, %cst_14 {dimension_numbers = #tpu.dot_dimension_numbers<[1], [0], [0], [1], [0, 0, 1, 1], [], []>} : vector<8x8xf32>, vector<8x128xf32>, vector<8x128xf32> -> vector<8x128xf32>
    %c0_15 = arith.constant 0 : index
    %c128 = arith.constant 128 : index
    %36 = vector.load %arg3[%c0_15, %c128] : memref<8x512xf32, #tpu.memory_space<vmem>>, vector<8x128xf32>
    tpu.vector_store %arg3[%c0_15, %c128], %35 {strides = array<i32>} : memref<8x512xf32, #tpu.memory_space<vmem>>, vector<8x128xf32>,
    %37 = vector.extract_strided_slice %2 {offsets = [0, 768], sizes = [8, 128], strides = [1, 1]} : vector<8x1536xf32> to vector<8x128xf32>
    %cst_16 = arith.constant 2.500000e-01 : f32
    %38 = vector.broadcast %cst_16 : f32 to vector<8x128xf32>
    %39 = arith.mulf %37, %38 : vector<8x128xf32>
    %40 = vector.extract_strided_slice %2 {offsets = [0, 896], sizes = [8, 128], strides = [1, 1]} : vector<8x1536xf32> to vector<8x128xf32>
    %41 = vector.extract_strided_slice %2 {offsets = [0, 1024], sizes = [8, 128], strides = [1, 1]} : vector<8x1536xf32> to vector<8x128xf32>
    %cst_17 = arith.constant dense<0.000000e+00> : vector<8x8xf32>
    %42 = tpu.matmul %39, %40, %cst_17 {dimension_numbers = #tpu.dot_dimension_numbers<[1], [1], [0], [0], [0, 0, 1, 0], [], []>} : vector<8x128xf32>, vector<8x128xf32>, vector<8x8xf32> -> vector<8x8xf32>
    %cst_18 = arith.constant dense<0xFF800000> : vector<8xf32>
    %43 = vector.multi_reduction <maximumf>, %42, %cst_18 [1] : vector<8x8xf32> to vector<8xf32>
    %44 = vector.shape_cast %43 : vector<8xf32> to vector<8x1xf32>
    %45 = vector.broadcast %44 : vector<8x1xf32> to vector<8x8xf32>
    %46 = arith.subf %42, %45 : vector<8x8xf32>
    %47 = math.exp %46 : vector<8x8xf32>
    %cst_19 = arith.constant dense<0.000000e+00> : vector<8xf32>
    %48 = vector.multi_reduction <add>, %47, %cst_19 [1] : vector<8x8xf32> to vector<8xf32>
    %49 = vector.shape_cast %48 : vector<8xf32> to vector<8x1xf32>
    %50 = vector.broadcast %49 : vector<8x1xf32> to vector<8x8xf32>
    %51 = arith.divf %47, %50 : vector<8x8xf32>
    %cst_20 = arith.constant dense<0.000000e+00> : vector<8x128xf32>
    %52 = tpu.matmul %51, %41, %cst_20 {dimension_numbers = #tpu.dot_dimension_numbers<[1], [0], [0], [1], [0, 0, 1, 1], [], []>} : vector<8x8xf32>, vector<8x128xf32>, vector<8x128xf32> -> vector<8x128xf32>
    %c0_21 = arith.constant 0 : index
    %c256 = arith.constant 256 : index
    %53 = vector.load %arg3[%c0_21, %c256] : memref<8x512xf32, #tpu.memory_space<vmem>>, vector<8x128xf32>
    tpu.vector_store %arg3[%c0_21, %c256], %52 {strides = array<i32>} : memref<8x512xf32, #tpu.memory_space<vmem>>, vector<8x128xf32>,
    %54 = vector.extract_strided_slice %2 {offsets = [0, 1152], sizes = [8, 128], strides = [1, 1]} : vector<8x1536xf32> to vector<8x128xf32>
    %cst_22 = arith.constant 2.500000e-01 : f32
    %55 = vector.broadcast %cst_22 : f32 to vector<8x128xf32>
    %56 = arith.mulf %54, %55 : vector<8x128xf32>
    %57 = vector.extract_strided_slice %2 {offsets = [0, 1280], sizes = [8, 128], strides = [1, 1]} : vector<8x1536xf32> to vector<8x128xf32>
    %58 = vector.extract_strided_slice %2 {offsets = [0, 1408], sizes = [8, 128], strides = [1, 1]} : vector<8x1536xf32> to vector<8x128xf32>
    %cst_23 = arith.constant dense<0.000000e+00> : vector<8x8xf32>
    %59 = tpu.matmul %56, %57, %cst_23 {dimension_numbers = #tpu.dot_dimension_numbers<[1], [1], [0], [0], [0, 0, 1, 0], [], []>} : vector<8x128xf32>, vector<8x128xf32>, vector<8x8xf32> -> vector<8x8xf32>
    %cst_24 = arith.constant dense<0xFF800000> : vector<8xf32>
    %60 = vector.multi_reduction <maximumf>, %59, %cst_24 [1] : vector<8x8xf32> to vector<8xf32>
    %61 = vector.shape_cast %60 : vector<8xf32> to vector<8x1xf32>
    %62 = vector.broadcast %61 : vector<8x1xf32> to vector<8x8xf32>
    %63 = arith.subf %59, %62 : vector<8x8xf32>
    %64 = math.exp %63 : vector<8x8xf32>
    %cst_25 = arith.constant dense<0.000000e+00> : vector<8xf32>
    %65 = vector.multi_reduction <add>, %64, %cst_25 [1] : vector<8x8xf32> to vector<8xf32>
    %66 = vector.shape_cast %65 : vector<8xf32> to vector<8x1xf32>
    %67 = vector.broadcast %66 : vector<8x1xf32> to vector<8x8xf32>
    %68 = arith.divf %64, %67 : vector<8x8xf32>
    %cst_26 = arith.constant dense<0.000000e+00> : vector<8x128xf32>
    %69 = tpu.matmul %68, %58, %cst_26 {dimension_numbers = #tpu.dot_dimension_numbers<[1], [0], [0], [1], [0, 0, 1, 1], [], []>} : vector<8x8xf32>, vector<8x128xf32>, vector<8x128xf32> -> vector<8x128xf32>
    %c0_27 = arith.constant 0 : index
    %c384 = arith.constant 384 : index
    %70 = vector.load %arg3[%c0_27, %c384] : memref<8x512xf32, #tpu.memory_space<vmem>>, vector<8x128xf32>
    tpu.vector_store %arg3[%c0_27, %c384], %69 {strides = array<i32>} : memref<8x512xf32, #tpu.memory_space<vmem>>, vector<8x128xf32>,
    return
  }
  func.func @transform_0(%arg0: i32) -> (i32, i32) {
    %c0_i32 = arith.constant 0 : i32
    %c0_i32_0 = arith.constant 0 : i32
    %c0_i32_1 = arith.constant 0 : i32
    return %c0_i32, %c0_i32_0 : i32, i32
  }
  func.func @transform_1(%arg0: i32) -> (i32, i32) {
    %c0_i32 = arith.constant 0 : i32
    %c0_i32_0 = arith.constant 0 : i32
    %c0_i32_1 = arith.constant 0 : i32
    return %c0_i32, %c0_i32_0 : i32, i32
  }
  func.func @transform_2(%arg0: i32) -> (i32, i32) {
    %c0_i32 = arith.constant 0 : i32
    %c0_i32_0 = arith.constant 0 : i32
    %c0_i32_1 = arith.constant 0 : i32
    return %c0_i32, %c0_i32_0 : i32, i32
  }
}

</mosaic_0001>

<bundles_post_ra>
// kernel: tpu_custom_call.1
= control target key start
LH: loop header
LB: loop body
LE: loop exit
PB: predicated region body
PF: predicated region fallthrough
CT: control target
= control target key end

     0   :  { %7 = vsyncpa [#allocation3], 0  ;;  %s820_s0 = inlined_call_operand.hbm [shape: f32[8,32], index: 0, kind: input, shape index: {}]   ;;  %s821_s1 = inlined_call_operand.hbm [shape: f32[32,1536], index: 1, kind: input, shape index: {}]   ;;  %s822_s2 = inlined_call_operand.hbm [shape: f32[8,512], index: 2, kind: output, shape index: {}]  }
   0x1   :  { %8 = vsyncpa [#allocation6], 0 }
   0x2   :  { %9 = vsyncpa [#allocation4], 0  ;;  %s15_s11 = sshll.u32 %s820_s0, 4  ;;  %s745_s12 = smov [#allocation2]   ;;  %s16_s11 = int_to_ptr.hbm [resolvable:$true] %s15_s11 }
   0x3   :  { %s17_s13 = sshll.u32 %s745_s12, 4  ;;  %s25_s16 = sshll.u32 %s821_s1, 4  ;;  %s18_s13 = int_to_ptr.vmem [resolvable:$true] %s17_s13  ;;  %s26_s16 = int_to_ptr.hbm [resolvable:$true] %s25_s16 }
   0x4   :  { %20 = dma.hbm_to_vmem [thread:$0]  %s16_s11, 128, %s18_s13, [#allocation3]  }
   0x5   :  { %s746_s17 = smov [#allocation5]   ;;  %s747_s19 = smov 1536  }
   0x6   :  { %s27_s18 = sshll.u32 %s746_s17, 4  ;;  %s748_s20 = smov 96   ;;  %s28_s18 = int_to_ptr.vmem [resolvable:$true] %s27_s18 }
   0x7   :  { %33 = dma.hbm_to_vmem [thread:$0]  %s26_s16, 6144, %s28_s18, [#allocation6], %s747_s19, %s747_s19, %s748_s20  }
   0x8   :  { %739 = dma.done.wait [#allocation3], 128  }
   0x9   :  { %740 = vsyncadd [#allocation3], 4294967168 }
   0xa   :  { %741 = dma.done.wait [#allocation6], 6144  }
   0xb   :  { %742 = vsyncadd [#allocation6], 4294961152  ;;  %v79_v0 = vld [vmem:[#allocation5 + $0x120] sm:$0xff]  ;;  %v81_v1 = vld [vmem:[#allocation5 + $0x130] sm:$0xff]  ;;  %vm91_vm0 = vcmask 261120   ;;  %vm356_vm1 = vcmask 64512  }
   0xc   :  { %v82_v2 = vld [vmem:[#allocation5 + $0x138] sm:$0xff]  ;;  %107 = vmatpush.msra.mxu0 %v79_v0  ;;  %147 = vmatpush.msra.mxu2 %v81_v1  ;;  %v67_v3 = vld [vmem:[#allocation5 + $0xc0] sm:$0xff]  ;;  %v69_v4 = vld [vmem:[#allocation5 + $0xd0] sm:$0xff]  ;;  %s749_s0 = smov [#allocation7]   ;;  %s619_s23 = sshll.u32 %s822_s2, 4  ;;  %s620_s23 = int_to_ptr.hbm [resolvable:$true] %s619_s23 }
   0xd   :  { %v70_v5 = vld [vmem:[#allocation5 + $0xd8] sm:$0xff]  ;;  %167 = vmatpush.msra.mxu3 %v82_v2  ;;  %v55_v6 = vld [vmem:[#allocation5 + $0x60] sm:$0xff]  ;;  %v57_v7 = vld [vmem:[#allocation5 + $0x70] sm:$0xff]  ;;  %s617_s1 = sshll.u32 %s749_s0, 4  ;;  %s618_s1 = int_to_ptr.vmem [resolvable:$true] %s617_s1 }
   0xe   :  { %108 = vmatpush.msra.mxu0 %v67_v3  ;;  %148 = vmatpush.msra.mxu2 %v69_v4  ;;  %v58_v8 = vld [vmem:[#allocation5 + $0x78] sm:$0xff]  ;;  %v80_v9 = vld [vmem:[#allocation5 + $0x128] sm:$0xff]  ;;  %v43_v10 = vld [vmem:[#allocation5] sm:$0xff] }
   0xf   :  { %168 = vmatpush.msra.mxu3 %v70_v5  ;;  %127 = vmatpush.msra.mxu1 %v80_v9  ;;  %v45_v11 = vld [vmem:[#allocation5 + $0x10] sm:$0xff]  ;;  %v68_v12 = vld [vmem:[#allocation5 + $0xc8] sm:$0xff]  ;;  %v46_v13 = vld [vmem:[#allocation5 + $0x18] sm:$0xff] }
  0x10   :  { %109 = vmatpush.msra.mxu0 %v55_v6  ;;  %149 = vmatpush.msra.mxu2 %v57_v7  ;;  %v771_v14 = vld [vmem:[#allocation2] sm:$0xff]  ;;  %v83_v15 = vld [vmem:[#allocation5 + $0x140] sm:$0xff]  ;;  %v85_v16 = vld [vmem:[#allocation5 + $0x150] sm:$0xff] }
  0x11   :  { %169 = vmatpush.msra.mxu3 %v58_v8  ;;  %128 = vmatpush.msra.mxu1 %v68_v12  ;;  %v86_v17 = vld [vmem:[#allocation5 + $0x158] sm:$0xff]  ;;  %v56_v18 = vld [vmem:[#allocation5 + $0x68] sm:$0xff]  ;;  %v71_v19 = vld [vmem:[#allocation5 + $0xe0] sm:$0xff] }
  0x12   :  { %110 = vmatpush.msra.mxu0 %v43_v10  ;;  %150 = vmatpush.msra.mxu2 %v45_v11  ;;  %v73_v20 = vld [vmem:[#allocation5 + $0xf0] sm:$0xff]  ;;  %v74_v21 = vld [vmem:[#allocation5 + $0xf8] sm:$0xff]  ;;  %v44_v22 = vld [vmem:[#allocation5 + $0x8] sm:$0xff] }
  0x13   :  { %170 = vmatpush.msra.mxu3 %v46_v13  ;;  %630 = vmatmul.msk.f32.vlgmr.msra.gmra.mxu0 %vm91_vm0, %v771_v14  ;;  %v59_v23 = vld [vmem:[#allocation5 + $0x80] sm:$0xff]  ;;  %v61_v24 = vld [vmem:[#allocation5 + $0x90] sm:$0xff]  ;;  %v62_v25 = vld [vmem:[#allocation5 + $0x98] sm:$0xff] }
  0x14   :  { %632 = vmatmul.msk.f32.vlgmr.msra.gmra.mxu2 %vm91_vm0, %v771_v14  ;;  %633 = vmatmul.msk.f32.vlgmr.msra.gmra.mxu3 %vm91_vm0, %v771_v14  ;;  %v47_v26 = vld [vmem:[#allocation5 + $0x20] sm:$0xff]  ;;  %v84_v27 = vld [vmem:[#allocation5 + $0x148] sm:$0xff]  ;;  %v49_v28 = vld [vmem:[#allocation5 + $0x30] sm:$0xff] }
  0x15   :  { %187 = vmatpush.msrb.mxu0 %v83_v15  ;;  %227 = vmatpush.msrb.mxu2 %v85_v16  ;;  %v50_v29 = vld [vmem:[#allocation5 + $0x38] sm:$0xff]  ;;  %v89_v30 = vld [vmem:[#allocation5 + $0x170] sm:$0xff]  ;;  %v72_v31 = vld [vmem:[#allocation5 + $0xe8] sm:$0xff] }
  0x16   :  { %247 = vmatpush.msrb.mxu3 %v86_v17  ;;  %129 = vmatpush.msra.mxu1 %v56_v18  ;;  %v87_v32 = vld [vmem:[#allocation5 + $0x160] sm:$0xff]  ;;  %v77_v33 = vld [vmem:[#allocation5 + $0x110] sm:$0xff]  ;;  %v60_v34 = vld [vmem:[#allocation5 + $0x88] sm:$0xff] }
  0x17   :  { %188 = vmatpush.msrb.mxu0 %v71_v19  ;;  %228 = vmatpush.msrb.mxu2 %v73_v20  ;;  %v75_v35 = vld [vmem:[#allocation5 + $0x100] sm:$0xff]  ;;  %v65_v36 = vld [vmem:[#allocation5 + $0xb0] sm:$0xff]  ;;  %v48_v37 = vld [vmem:[#allocation5 + $0x28] sm:$0xff] }
  0x18   :  { %248 = vmatpush.msrb.mxu3 %v74_v21  ;;  %130 = vmatpush.msra.mxu1 %v44_v22  ;;  %v63_v38 = vld [vmem:[#allocation5 + $0xa0] sm:$0xff]  ;;  %v53_v39 = vld [vmem:[#allocation5 + $0x50] sm:$0xff]  ;;  %v88_v40 = vld [vmem:[#allocation5 + $0x168] sm:$0xff] }
  0x19   :  { %631 = vmatmul.msk.f32.vlgmr.msra.gmra.mxu1 %vm91_vm0, %v771_v14  ;;  %189 = vmatpush.msrb.mxu0 %v59_v23  ;;  %v76_v41 = vld [vmem:[#allocation5 + $0x108] sm:$0xff]  ;;  %v51_v44 = vld [vmem:[#allocation5 + $0x40] sm:$0xff]  ;;  %v90_v45 = vld [vmem:[#allocation5 + $0x178] sm:$0xff] }
  0x1a   :  { %229 = vmatpush.msrb.mxu2 %v61_v24  ;;  %249 = vmatpush.msrb.mxu3 %v62_v25  ;;  %v64_v42 = vld [vmem:[#allocation5 + $0xa8] sm:$0xff]  ;;  %v78_v46 = vld [vmem:[#allocation5 + $0x118] sm:$0xff] }
  0x1b   :  { %190 = vmatpush.msrb.mxu0 %v47_v26  ;;  %207 = vmatpush.msrb.mxu1 %v84_v27  ;;  %v52_v43 = vld [vmem:[#allocation5 + $0x48] sm:$0xff]  ;;  %v66_v47 = vld [vmem:[#allocation5 + $0xb8] sm:$0xff] }
  0x1c   :  { %230 = vmatpush.msrb.mxu2 %v49_v28  ;;  %250 = vmatpush.msrb.mxu3 %v50_v29  ;;  %v54_v48 = vld [vmem:[#allocation5 + $0x58] sm:$0xff] }
  0x1d   :  { %634 = vmatmul.msk.f32.vlgmr.msrb.gmra.mxu0 %vm91_vm0, %v771_v14  ;;  %636 = vmatmul.msk.f32.vlgmr.msrb.gmra.mxu2 %vm91_vm0, %v771_v14 }
  0x1e   :  { %637 = vmatmul.msk.f32.vlgmr.msrb.gmra.mxu3 %vm91_vm0, %v771_v14  ;;  %307 = vmatpush.msra.mxu2 %v89_v30 }
  0x1f   :  { %208 = vmatpush.msrb.mxu1 %v72_v31  ;;  %267 = vmatpush.msra.mxu0 %v87_v32 }
  0x20   :  { %308 = vmatpush.msra.mxu2 %v77_v33  ;;  %327 = vmatpush.msra.mxu3 %v90_v45 }
  0x21   :  { %209 = vmatpush.msrb.mxu1 %v60_v34  ;;  %268 = vmatpush.msra.mxu0 %v75_v35 }
  0x22   :  { %309 = vmatpush.msra.mxu2 %v65_v36  ;;  %328 = vmatpush.msra.mxu3 %v78_v46 }
  0x23   :  { %210 = vmatpush.msrb.mxu1 %v48_v37  ;;  %269 = vmatpush.msra.mxu0 %v63_v38 }
  0x24   :  { %635 = vmatmul.msk.f32.vlgmr.msrb.gmra.mxu1 %vm91_vm0, %v771_v14  ;;  %310 = vmatpush.msra.mxu2 %v53_v39 }
  0x25   :  { %287 = vmatpush.msra.mxu1 %v88_v40  ;;  %640 = vmatmul.msk.f32.vlgmr.msra.gmra.mxu2 %vm91_vm0, %v771_v14 }
  0x26   :  { %270 = vmatpush.msra.mxu0 %v51_v44  ;;  %329 = vmatpush.msra.mxu3 %v66_v47 }
  0x27   :  { %288 = vmatpush.msra.mxu1 %v76_v41  ;;  %638 = vmatmul.msk.f32.vlgmr.msra.gmra.mxu0 %vm91_vm0, %v771_v14 }
  0x28   :  { %330 = vmatpush.msra.mxu3 %v54_v48 }
  0x29   :  { %289 = vmatpush.msra.mxu1 %v64_v42  ;;  %641 = vmatmul.msk.f32.vlgmr.msra.gmra.mxu3 %vm91_vm0, %v771_v14 }
  0x2b   :  { %290 = vmatpush.msra.mxu1 %v52_v43 }
  0x2c   :  { %639 = vmatmul.msk.f32.vlgmr.msra.gmra.mxu1 %vm91_vm0, %v771_v14 }
  0x90   :  { %v112_v49 = vpop.f32.mrf.mxu0 }
  0x91   :  { %v335_v50 = vmul.f32 0.25, %v112_v49 }
  0x96   :  { %v132_v51 = vpop.f32.mrf.mxu1 }
  0x97   :  { %v152_v52 = vpop.f32.mrf.mxu2  ;;  %v172_v53 = vpop.f32.mrf.mxu3  ;;  %351 = vmatpush.xpose.msrb.mxu0 %v132_v51 }
  0x98   :  { %399 = vmatpush.msrb.mxu1 %v152_v52  ;;  %v405_v54 = vmul.f32 0.25, %v172_v53 }
  0x9a   :  { %v192_v55 = vpop.f32.mrf.mxu0  ;;  %352 = vmatmul.f32.vlgmr.msrb.gmra.mxu0 %v335_v50 }
  0x9b   :  { %421 = vmatpush.xpose.msrb.mxu2 %v192_v55 }
  0x9e   :  { %422 = vmatmul.f32.vlgmr.msrb.gmra.mxu2 %v405_v54 }
  0xa0   :  { %v232_v56 = vpop.f32.mrf.mxu2 }
  0xa1   :  { %v474_v57 = vmul.f32 0.25, %v232_v56  ;;  %v252_v58 = vpop.f32.mrf.mxu3  ;;  %v212_v59 = vpop.f32.mrf.mxu1 }
  0xa2   :  { %490 = vmatpush.xpose.msra.mxu0 %v252_v58  ;;  %468 = vmatpush.msrb.mxu3 %v212_v59 }
  0xa4   :  { %v272_v63 = vpop.f32.mrf.mxu0 }
  0xa5   :  { %491 = vmatmul.f32.vlgmr.msra.gmra.mxu0 %v474_v57  ;;  %537 = vmatpush.msra.mxu1 %v272_v63 }
  0xa8   :  { %v312_v60 = vpop.f32.mrf.mxu2 }
  0xa9   :  { %v292_v61 = vpop.f32.mrf.mxu1  ;;  %559 = vmatpush.xpose.msra.mxu2 %v312_v60 }
  0xaa   :  { %v543_v62 = vmul.f32 0.25, %v292_v61 }
  0xac   :  { %560 = vmatmul.f32.vlgmr.msra.gmra.mxu2 %v543_v62  ;;  %v332_v29 = vpop.f32.mrf.mxu3 }
  0xad   :  { %606 = vmatpush.msra.mxu3 %v332_v29 }
 0x117   :  { %v353_v2 = vpop.f32.mrf.mxu0 }
 0x118   :  { %v357_v3 = vsel %vm356_vm1, %v353_v2, -inf }
 0x121   :  { %v423_v0 = vpop.f32.mrf.mxu2 }
 0x122   :  { %v426_v1 = vsel %vm356_vm1, %v423_v0, -inf  ;;  %v492_v6 = vpop.f32.mrf.mxu0 }
 0x123   :  { %427 = vmax.xlane.f32.xlu0 %v426_v1  ;;  %v495_v7 = vsel %vm356_vm1, %v492_v6, -inf }
 0x12b   :  { %358 = vmax.xlane.f32.xlu0 %v357_v3 }
 0x12f   :  { %v561_v4 = vpop.f32.mrf.mxu2 }
 0x130   :  { %v564_v5 = vsel %vm356_vm1, %v561_v4, -inf }
 0x131   :  { %565 = vmax.xlane.f32.xlu1 %v564_v5 }
 0x139   :  { %496 = vmax.xlane.f32.xlu1 %v495_v7 }
 0x196   :  { %v428_v8 = vpop.xlane.xlu0 %427 }
 0x197   :  { %v429_v9 = vsub.f32 %v423_v0, %v428_v8 }
 0x199   :  { %v430_v10 = vmul.f32 1.442695, %v429_v9 }
 0x19b   :  { %651 = vpow2.f32 %v430_v10 }
 0x19e   :  { %v359_v11 = vpop.xlane.xlu0 %358 }
 0x19f   :  { %v360_v12 = vsub.f32 %v353_v2, %v359_v11 }
 0x1a1   :  { %v652_v13 = vpop.eup %651  ;;  %v361_v14 = vmul.f32 1.442695, %v360_v12 }
 0x1a2   :  { %v432_v15 = vsel %vm356_vm1, %v652_v13, 0.0 }
 0x1a3   :  { %653 = vpow2.f32 %v361_v14  ;;  %433 = vadd.xlane.f32.xlu2 %v432_v15 }
 0x1a4   :  { %v566_v16 = vpop.xlane.xlu1 %565 }
 0x1a5   :  { %v567_v17 = vsub.f32 %v561_v4, %v566_v16 }
 0x1a7   :  { %v568_v18 = vmul.f32 1.442695, %v567_v17 }
 0x1a9   :  { %v654_v19 = vpop.eup %653  ;;  %655 = vpow2.f32 %v568_v18 }
 0x1aa   :  { %v363_v20 = vsel %vm356_vm1, %v654_v19, 0.0 }
 0x1ab   :  { %364 = vadd.xlane.f32.xlu2 %v363_v20 }
 0x1ac   :  { %v497_v21 = vpop.xlane.xlu1 %496 }
 0x1ad   :  { %v498_v22 = vsub.f32 %v492_v6, %v497_v21 }
 0x1af   :  { %v803_v23 = vpop.eup %655  ;;  %v499_v24 = vmul.f32 1.442695, %v498_v22 }
 0x1b0   :  { %v570_v25 = vsel %vm356_vm1, %v803_v23, 0.0 }
 0x1b1   :  { %657 = vpow2.f32 %v499_v24  ;;  %571 = vadd.xlane.f32.xlu0 %v570_v25 }
 0x1b7   :  { %v807_v26 = vpop.eup %657 }
 0x1b8   :  { %v501_v27 = vsel %vm356_vm1, %v807_v26, 0.0 }
 0x1b9   :  { %502 = vadd.xlane.f32.xlu1 %v501_v27 }
 0x216   :  { %v434_v28 = vpop.xlane.xlu2 %433 }
 0x217   :  { %659 = vrcp.f32 %v434_v28  ;;  %v446_v34 = vand.u32 2147483648, %v434_v28  ;;  %v444_v36 = vand.u32 2147483647, %v434_v28  ;;  %vm440_vm3 = vweird.f32 %v434_v28 }
 0x219   :  { %v447_v40 = vor.u32 1.1754944e-38, %v446_v34  ;;  %vm445_vm5 = vcmp.eq.f32.partialorder %v444_v36, 8.507059e+37 }
 0x21d   :  { %v660_v30 = vpop.eup %659 }
 0x21e   :  { %v436_v31 = vmul.f32 %v660_v30, %v434_v28  ;;  %v365_v32 = vpop.xlane.xlu2 %364  ;;  %vm441_vm2 = vweird.f32 %v660_v30 }
 0x21f   :  { %661 = vrcp.f32 %v365_v32  ;;  %vm442_vm4 = vmor %vm440_vm3, %vm441_vm2  ;;  %v377_v46 = vand.u32 2147483648, %v365_v32  ;;  %v375_v48 = vand.u32 2147483647, %v365_v32  ;;  %vm371_vm7 = vweird.f32 %v365_v32 }
 0x220   :  { %v437_v33 = vsub.f32 1.0, %v436_v31 }
 0x221   :  { %v378_v53 = vor.u32 1.1754944e-38, %v377_v46  ;;  %vm376_vm9 = vcmp.eq.f32.partialorder %v375_v48, 8.507059e+37 }
 0x222   :  { %v438_v35 = vmul.f32 %v660_v30, %v437_v33 }
 0x224   :  { %v439_v37 = vadd.f32 %v660_v30, %v438_v35  ;;  %v572_v38 = vpop.xlane.xlu0 %571 }
 0x225   :  { %v662_v39 = vpop.eup %661  ;;  %663 = vrcp.f32 %v572_v38  ;;  %v584_v57 = vand.u32 2147483648, %v572_v38  ;;  %v582_v60 = vand.u32 2147483647, %v572_v38  ;;  %vm578_vm11 = vweird.f32 %v572_v38 }
 0x226   :  { %v443_v41 = vsel %vm442_vm4, %v660_v30, %v439_v37  ;;  %v367_v42 = vmul.f32 %v662_v39, %v365_v32  ;;  %vm372_vm6 = vweird.f32 %v662_v39 }
 0x227   :  { %v448_v43 = vsel %vm445_vm5, %v447_v40, %v443_v41  ;;  %vm373_vm8 = vmor %vm371_vm7, %vm372_vm6  ;;  %v585_v63 = vor.u32 1.1754944e-38, %v584_v57  ;;  %vm583_vm13 = vcmp.eq.f32.partialorder %v582_v60, 8.507059e+37 }
 0x228   :  { %v368_v44 = vsub.f32 1.0, %v367_v42  ;;  %v449_v45 = vmul.f32 %v652_v13, %v448_v43 }
 0x22a   :  { %v369_v47 = vmul.f32 %v662_v39, %v368_v44  ;;  %643 = vmatmul.msk.f32.vlgmr.msrb.gmra.mxu3 %vm356_vm1, %v449_v45 }
 0x22b   :  { %v664_v49 = vpop.eup %663 }
 0x22c   :  { %v370_v50 = vadd.f32 %v662_v39, %v369_v47  ;;  %v574_v51 = vmul.f32 %v664_v49, %v572_v38  ;;  %v503_v52 = vpop.xlane.xlu1 %502  ;;  %vm579_vm10 = vweird.f32 %v664_v49 }
 0x22d   :  { %665 = vrcp.f32 %v503_v52  ;;  %vm580_vm12 = vmor %vm578_vm11, %vm579_vm10  ;;  %v515_v5 = vand.u32 2147483648, %v503_v52  ;;  %v513_v7 = vand.u32 2147483647, %v503_v52  ;;  %vm509_vm15 = vweird.f32 %v503_v52 }
 0x22e   :  { %v374_v54 = vsel %vm373_vm8, %v662_v39, %v370_v50  ;;  %v575_v55 = vsub.f32 1.0, %v574_v51 }
 0x22f   :  { %v379_v56 = vsel %vm376_vm9, %v378_v53, %v374_v54  ;;  %v516_v9 = vor.u32 1.1754944e-38, %v515_v5  ;;  %vm514_vm2 = vcmp.eq.f32.partialorder %v513_v7, 8.507059e+37 }
 0x230   :  { %v380_v58 = vmul.f32 %v654_v19, %v379_v56  ;;  %v576_v59 = vmul.f32 %v664_v49, %v575_v55 }
 0x232   :  { %v577_v61 = vadd.f32 %v664_v49, %v576_v59  ;;  %642 = vmatmul.msk.f32.vlgmr.msrb.gmra.mxu1 %vm356_vm1, %v380_v58 }
 0x233   :  { %v666_v62 = vpop.eup %665 }
 0x234   :  { %v581_v0 = vsel %vm580_vm12, %v664_v49, %v577_v61  ;;  %v505_v1 = vmul.f32 %v666_v62, %v503_v52  ;;  %vm510_vm14 = vweird.f32 %v666_v62 }
 0x235   :  { %v586_v2 = vsel %vm583_vm13, %v585_v63, %v581_v0  ;;  %vm511_vm0 = vmor %vm509_vm15, %vm510_vm14 }
 0x236   :  { %v587_v3 = vmul.f32 %v803_v23, %v586_v2  ;;  %v506_v4 = vsub.f32 1.0, %v505_v1 }
 0x238   :  { %v507_v6 = vmul.f32 %v666_v62, %v506_v4  ;;  %645 = vmatmul.msk.f32.vlgmr.msra.gmra.mxu3 %vm356_vm1, %v587_v3 }
 0x23a   :  { %v508_v8 = vadd.f32 %v666_v62, %v507_v6 }
 0x23c   :  { %v512_v10 = vsel %vm511_vm0, %v666_v62, %v508_v8 }
 0x23d   :  { %v517_v11 = vsel %vm514_vm2, %v516_v9, %v512_v10 }
 0x23e   :  { %v518_v12 = vmul.f32 %v807_v26, %v517_v11 }
 0x240   :  { %644 = vmatmul.msk.f32.vlgmr.msra.gmra.mxu1 %vm356_vm1, %v518_v12 }
 0x2ad   :  { %v470_v13 = vpop.f32.mrf.mxu3 }
 0x2ae   :  { %473 = vst [vmem:[#allocation7 + $0x8] sm:$0xff] %v470_v13 }
 0x2af   :  { %v401_v14 = vpop.f32.mrf.mxu1 }
 0x2b0   :  { %404 = vst [vmem:[#allocation7] sm:$0xff] %v401_v14 }
 0x2bb   :  { %v608_v15 = vpop.f32.mrf.mxu3 }
 0x2bc   :  { %611 = vst [vmem:[#allocation7 + $0x18] sm:$0xff] %v608_v15 }
 0x2bd   :  { %v539_v16 = vpop.f32.mrf.mxu1 }
 0x2be   :  { %542 = vst [vmem:[#allocation7 + $0x10] sm:$0xff] %v539_v16 }
 0x2bf   :  { %622 = dma.vmem_to_hbm [thread:$0]  %s618_s1, 512, %s620_s23, [#allocation4]  }
 0x2c0   :  { %743 = dma.done.wait [#allocation4], 512  }
 0x2c1   :  { %744 = vsyncadd [#allocation4], 4294966784 }
 0x2c2   :  { %627 = vsyncpa [#allocation3], 1 }
 0x2c3   :  { %628 = vsyncpa [#allocation6], 1 }
 0x2c4   :  { %629 = vsyncpa [#allocation4], 1 }

</bundles_post_ra>
